<compile_context>
chip_gen: v7x
topology: tpu7x:2x2x1
jax: 0.10.0
libtpu: 0.0.40
codegen_flags: <defaults>
</compile_context>

<pallas_src>
import functools

import jax
import jax.numpy as jnp
from jax import lax
from jax.experimental import pallas as pl
from jax.experimental.pallas import tpu as pltpu

_DEFAULT_BLOCK_BYTES = 2 * 1024 * 1024   # ~2 MiB f32 per block -> ~8 MiB double-buffered in+out


# ----------------------------------------------------------------------------
# Tile selection (byte-capped, no padding, no forced splits)
# ----------------------------------------------------------------------------

def _row_tile(M, C, block_bytes):
    """Row tile for (M, C) f32 blocks: full M if it fits, else a multiple of 8 under the byte cap."""
    max_rows = max(8, block_bytes // (4 * C))
    if M <= max_rows:
        return M                               # one grid step, full dim -> always a legal block
    return max(8, (max_rows // 8) * 8)


def _chan_tile(N, C, block_bytes):
    """Channel tile for (1, N, TC) blocks: multiple of 128 that divides C, under the byte cap."""
    if C % 128 != 0:
        return C                               # full channel dim is always a legal block
    n128 = C // 128
    max_k = max(1, block_bytes // (4 * N * 128))
    k = min(n128, max_k)
    while n128 % k:                            # largest divisor of C/128 under the cap
        k -= 1
    return k * 128


# ----------------------------------------------------------------------------
# Kernels (single fused pass each; all math in f32, rsqrt on the EUP)
# ----------------------------------------------------------------------------

def _pixelnorm_kernel(eps, x_ref, o_ref):
    x = x_ref[...].astype(jnp.float32)
    ms = jnp.mean(x * x, axis=-1, keepdims=True)
    o_ref[...] = (x * lax.rsqrt(ms + eps)).astype(o_ref.dtype)


def _layernorm_kernel(eps, x_ref, g_ref, b_ref, o_ref):
    x = x_ref[...].astype(jnp.float32)
    mu = jnp.mean(x, axis=-1, keepdims=True)
    xc = x - mu
    var = jnp.mean(xc * xc, axis=-1, keepdims=True)
    o_ref[...] = (xc * lax.rsqrt(var + eps) * g_ref[...] + b_ref[...]).astype(o_ref.dtype)


def _instnorm_kernel(eps, x_ref, o_ref):
    x = x_ref[...].astype(jnp.float32)           # (1, N, TC): reduce over the token axis
    mu = jnp.mean(x, axis=1, keepdims=True)
    xc = x - mu
    var = jnp.mean(xc * xc, axis=1, keepdims=True)   # biased, per (batch, channel)
    o_ref[...] = (xc * lax.rsqrt(var + eps)).astype(o_ref.dtype)


def _bn_stats_kernel(M, t, steps, x_ref, sum_ref, sq_ref):
    """Per-channel sum / sum-of-squares over the row range owned by group g=program_id(0)."""
    g = pl.program_id(0)
    i = pl.program_id(1)

    @pl.when(i == 0)
    def _():
        sum_ref[...] = jnp.zeros_like(sum_ref)
        sq_ref[...] = jnp.zeros_like(sq_ref)

    x = x_ref[...].astype(jnp.float32)
    if M % t != 0:                               # static: only the ragged tail needs masking
        row0 = (g * steps + i) * t
        valid = (row0 + lax.broadcasted_iota(jnp.int32, x.shape, 0)) < M
        x = jnp.where(valid, x, 0.0)
    sum_ref[...] += jnp.sum(x, axis=0, keepdims=True)[None]
    sq_ref[...] += jnp.sum(x * x, axis=0, keepdims=True)[None]


def _bn_normalize_kernel(eps, inv_m, x_ref, s_ref, sq_ref, g_ref, b_ref, o_ref):
    """Finalize folded in: mean/var/scale/shift recomputed per tile on (1,C) -- hidden under DMA."""
    mean = jnp.sum(s_ref[...], axis=0) * inv_m          # (1, C)
    ex2 = jnp.sum(sq_ref[...], axis=0) * inv_m          # (1, C)
    # NOTE: E[x^2]-E[x]^2 in f32 can cancel for large-mean activations; fine for GAN features.
    var = jnp.maximum(ex2 - mean * mean, 0.0)            # biased variance (training-mode BN)
    scale = g_ref[...] * lax.rsqrt(var + eps)
    shift = b_ref[...] - mean * scale
    x = x_ref[...].astype(jnp.float32)
    o_ref[...] = (x * scale + shift).astype(o_ref.dtype)


# ----------------------------------------------------------------------------
# Wrappers
# ----------------------------------------------------------------------------

def pallas_pixel_norm(x2d, eps=1e-8, block_bytes=_DEFAULT_BLOCK_BYTES):
    M, C = x2d.shape
    t = _row_tile(M, C, block_bytes)
    return pl.pallas_call(
        functools.partial(_pixelnorm_kernel, eps),
        out_shape=jax.ShapeDtypeStruct((M, C), x2d.dtype),
        grid=(pl.cdiv(M, t),),
        in_specs=[pl.BlockSpec((t, C), lambda i: (i, 0))],
        out_specs=pl.BlockSpec((t, C), lambda i: (i, 0)),
        compiler_params=pltpu.CompilerParams(dimension_semantics=("parallel",)),
    )(x2d)


def pallas_layer_norm(x2d, gamma, beta, eps=1e-5, block_bytes=_DEFAULT_BLOCK_BYTES):
    M, C = x2d.shape
    t = _row_tile(M, C, block_bytes)
    return pl.pallas_call(
        functools.partial(_layernorm_kernel, eps),
        out_shape=jax.ShapeDtypeStruct((M, C), x2d.dtype),
        grid=(pl.cdiv(M, t),),
        in_specs=[pl.BlockSpec((t, C), lambda i: (i, 0)),
                  pl.BlockSpec((1, C), lambda i: (0, 0)),
                  pl.BlockSpec((1, C), lambda i: (0, 0))],
        out_specs=pl.BlockSpec((t, C), lambda i: (i, 0)),
        compiler_params=pltpu.CompilerParams(dimension_semantics=("parallel",)),
    )(x2d, gamma.reshape(1, C).astype(jnp.float32),
      beta.reshape(1, C).astype(jnp.float32))


def pallas_instance_norm(x, eps=1e-5, block_bytes=_DEFAULT_BLOCK_BYTES):
    B, N, C = x.shape
    tc = _chan_tile(N, C, block_bytes)
    return pl.pallas_call(
        functools.partial(_instnorm_kernel, eps),
        out_shape=jax.ShapeDtypeStruct((B, N, C), x.dtype),
        grid=(B, pl.cdiv(C, tc)),
        in_specs=[pl.BlockSpec((1, N, tc), lambda b, c: (b, 0, c))],
        out_specs=pl.BlockSpec((1, N, tc), lambda b, c: (b, 0, c)),
        compiler_params=pltpu.CompilerParams(dimension_semantics=("parallel", "parallel")),
    )(x)


def pallas_batch_norm(x2d, gamma, beta, eps=1e-5, block_bytes=_DEFAULT_BLOCK_BYTES):
    M, C = x2d.shape

    # --- pass 1: per-channel sum / sum-of-squares (pure read of x) --------------------------
    # Stats pass only double-buffers its input (accumulators are VMEM-resident), so give it
    # ~2x the byte budget -> half the grid steps of the normalize pass.
    t_s = _row_tile(M, C, 2 * block_bytes)
    nt = pl.cdiv(M, t_s)
    # Shard the row range into G groups along a 'parallel' leading axis: on v7x the two
    # TensorCores split the stats reduction; on single-TC chips it costs one extra (1,C) add.
    G = 2 if (nt % 2 == 0 and nt >= 4) else 1
    steps = nt // G

    s, sq = pl.pallas_call(
        functools.partial(_bn_stats_kernel, M, t_s, steps),
        out_shape=(jax.ShapeDtypeStruct((G, 1, C), jnp.float32),
                   jax.ShapeDtypeStruct((G, 1, C), jnp.float32)),
        grid=(G, steps),
        in_specs=[pl.BlockSpec((t_s, C), lambda g, i: (g * steps + i, 0))],
        out_specs=(pl.BlockSpec((1, 1, C), lambda g, i: (g, 0, 0)),
                   pl.BlockSpec((1, 1, C), lambda g, i: (g, 0, 0))),
        compiler_params=pltpu.CompilerParams(dimension_semantics=("parallel", "arbitrary")),
    )(x2d)

    # --- pass 2: fused finalize + normalize + affine -----------------------------------------
    t_n = _row_tile(M, C, block_bytes)
    return pl.pallas_call(
        functools.partial(_bn_normalize_kernel, eps, 1.0 / M),
        out_shape=jax.ShapeDtypeStruct((M, C), x2d.dtype),
        grid=(pl.cdiv(M, t_n),),
        in_specs=[pl.BlockSpec((t_n, C), lambda i: (i, 0)),
                  pl.BlockSpec((G, 1, C), lambda i: (0, 0, 0)),
                  pl.BlockSpec((G, 1, C), lambda i: (0, 0, 0)),
                  pl.BlockSpec((1, C), lambda i: (0, 0)),
                  pl.BlockSpec((1, C), lambda i: (0, 0))],
        out_specs=pl.BlockSpec((t_n, C), lambda i: (i, 0)),
        compiler_params=pltpu.CompilerParams(dimension_semantics=("parallel",)),
    )(x2d, s, sq, gamma.reshape(1, C).astype(jnp.float32),
      beta.reshape(1, C).astype(jnp.float32))


# ----------------------------------------------------------------------------
# CustomNorm.forward
# ----------------------------------------------------------------------------

def custom_norm_forward(norm_type, x, gamma=None, beta=None,
                        block_bytes=_DEFAULT_BLOCK_BYTES):
    """CustomNorm.forward on token tensors x of shape (B, N, dim)."""
    B, N, C = x.shape
    if norm_type == "ln":
        return pallas_layer_norm(x.reshape(B * N, C), gamma, beta, 1e-5,
                                 block_bytes).reshape(B, N, C)
    if norm_type == "pn":
        return pallas_pixel_norm(x.reshape(B * N, C), 1e-8, block_bytes).reshape(B, N, C)
    if norm_type == "in":
        # permute(0,2,1) -> InstanceNorm1d -> permute back == reduce over token axis; no affine.
        return pallas_instance_norm(x, 1e-5, block_bytes)
    if norm_type == "bn":
        # permute(0,2,1) -> BatchNorm1d -> permute back; training-mode batch statistics.
        # TODO(synk): eval-mode running_mean/running_var (momentum) tracking is not modeled.
        return pallas_batch_norm(x.reshape(B * N, C), gamma, beta, 1e-5,
                                 block_bytes).reshape(B, N, C)
    raise ValueError(f"unknown norm_type {norm_type!r}")


# ----------------------------------------------------------------------------
# Pure-JAX reference (correctness check)
# ----------------------------------------------------------------------------

def _reference(norm_type, x, gamma, beta):
    if norm_type == "ln":
        mu = jnp.mean(x, -1, keepdims=True)
        var = jnp.var(x, -1, keepdims=True)
        return (x - mu) / jnp.sqrt(var + 1e-5) * gamma + beta
    if norm_type == "in":
        mu = jnp.mean(x, 1, keepdims=True)
        var = jnp.var(x, 1, keepdims=True)
        return (x - mu) / jnp.sqrt(var + 1e-5)
    if norm_type == "bn":
        mu = jnp.mean(x, (0, 1), keepdims=True)
        var = jnp.var(x, (0, 1), keepdims=True)
        return (x - mu) / jnp.sqrt(var + 1e-5) * gamma + beta
    ms = jnp.mean(x * x, -1, keepdims=True)
    return x * lax.rsqrt(ms + 1e-8)


# ----------------------------------------------------------------------------
# Main
# ----------------------------------------------------------------------------

if __name__ == "__main__":
    key = jax.random.PRNGKey(0)

    def check(B, N, DIM, block_bytes):
        kx, kg, kb = jax.random.split(jax.random.fold_in(key, 1000 * B + N), 3)
        x = jax.random.normal(kx, (B, N, DIM), jnp.float32)
        # PyTorch init is gamma=1, beta=0; use non-trivial params to exercise the affine path.
        gamma = 1.0 + 0.1 * jax.random.normal(kg, (DIM,), jnp.float32)
        beta = 0.1 * jax.random.normal(kb, (DIM,), jnp.float32)
        for nt in ("ln", "in", "bn", "pn"):
            fwd = jax.jit(functools.partial(custom_norm_forward, nt, block_bytes=block_bytes))
            y = jax.block_until_ready(fwd(x, gamma, beta))
            assert y.shape == x.shape, (nt, y.shape)
            assert bool(jnp.all(jnp.isfinite(y))), nt
            y_ref = _reference(nt, x, gamma, beta)
            assert bool(jnp.allclose(y, y_ref, rtol=1e-4, atol=1e-4)), nt

    # Default byte cap: single-step / few-step path (typical TransGAN token shapes).
    check(2, 64, 256, _DEFAULT_BLOCK_BYTES)
    # Tiny byte cap + non-multiple-of-8 row count: exercises multi-step grids, ragged tail
    # blocks (no padding), in-kernel BN row masking, and the 2-group BN stats split.
    check(2, 63, 256, 8 * 1024)

    print("KERNEL_OK")
</pallas_src>

<mosaic_0001>
module attributes {stable_mosaic.version = 11 : i64} {
  func.func @_layernorm_kernel(%arg0: i32, %arg1: memref<128x256xf32, #tpu.memory_space<vmem>>, %arg2: memref<1x256xf32, #tpu.memory_space<vmem>>, %arg3: memref<1x256xf32, #tpu.memory_space<vmem>>, %arg4: memref<128x256xf32, #tpu.memory_space<vmem>>) attributes {dimension_semantics = [#tpu.dimension_semantics<parallel>], iteration_bounds = array<i64: 1>, scalar_prefetch = 0 : i64, scratch_operands = 0 : i64, tpu.core_type = #tpu.core_type<tc>, window_params = [{transform_indices = @transform_0, window_bounds = array<i64: 128, 256>}, {pipeline_mode = #tpu.pipeline_mode<synchronous>, transform_indices = @transform_1, window_bounds = array<i64: 1, 256>}, {pipeline_mode = #tpu.pipeline_mode<synchronous>, transform_indices = @transform_2, window_bounds = array<i64: 1, 256>}, {transform_indices = @transform_3, window_bounds = array<i64: 128, 256>}]} {
    %c0 = arith.constant 0 : index
    %c0_0 = arith.constant 0 : index
    %0 = vector.load %arg1[%c0, %c0_0] : memref<128x256xf32, #tpu.memory_space<vmem>>, vector<128x256xf32>
    %cst = arith.constant dense<0.000000e+00> : vector<128xf32>
    %1 = vector.multi_reduction <add>, %0, %cst [1] : vector<128x256xf32> to vector<128xf32>
    %2 = vector.shape_cast %1 : vector<128xf32> to vector<128x1xf32>
    %cst_1 = arith.constant 2.560000e+02 : f32
    %3 = vector.broadcast %cst_1 : f32 to vector<128x1xf32>
    %4 = arith.divf %2, %3 : vector<128x1xf32>
    %5 = vector.broadcast %4 : vector<128x1xf32> to vector<128x256xf32>
    %6 = arith.subf %0, %5 : vector<128x256xf32>
    %7 = arith.mulf %6, %6 : vector<128x256xf32>
    %cst_2 = arith.constant dense<0.000000e+00> : vector<128xf32>
    %8 = vector.multi_reduction <add>, %7, %cst_2 [1] : vector<128x256xf32> to vector<128xf32>
    %9 = vector.shape_cast %8 : vector<128xf32> to vector<128x1xf32>
    %cst_3 = arith.constant 2.560000e+02 : f32
    %10 = vector.broadcast %cst_3 : f32 to vector<128x1xf32>
    %11 = arith.divf %9, %10 : vector<128x1xf32>
    %cst_4 = arith.constant 9.99999974E-6 : f32
    %12 = vector.broadcast %cst_4 : f32 to vector<128x1xf32>
    %13 = arith.addf %11, %12 : vector<128x1xf32>
    %14 = math.rsqrt %13 : vector<128x1xf32>
    %15 = vector.broadcast %14 : vector<128x1xf32> to vector<128x256xf32>
    %16 = arith.mulf %6, %15 : vector<128x256xf32>
    %c0_5 = arith.constant 0 : index
    %c0_6 = arith.constant 0 : index
    %17 = vector.load %arg2[%c0_5, %c0_6] : memref<1x256xf32, #tpu.memory_space<vmem>>, vector<1x256xf32>
    %18 = vector.broadcast %17 : vector<1x256xf32> to vector<128x256xf32>
    %19 = arith.mulf %16, %18 : vector<128x256xf32>
    %c0_7 = arith.constant 0 : index
    %c0_8 = arith.constant 0 : index
    %20 = vector.load %arg3[%c0_7, %c0_8] : memref<1x256xf32, #tpu.memory_space<vmem>>, vector<1x256xf32>
    %21 = vector.broadcast %20 : vector<1x256xf32> to vector<128x256xf32>
    %22 = arith.addf %19, %21 : vector<128x256xf32>
    %c0_9 = arith.constant 0 : index
    %c0_10 = arith.constant 0 : index
    %23 = vector.load %arg4[%c0_9, %c0_10] : memref<128x256xf32, #tpu.memory_space<vmem>>, vector<128x256xf32>
    tpu.vector_store %arg4[%c0_9, %c0_10], %22 {strides = array<i32>} : memref<128x256xf32, #tpu.memory_space<vmem>>, vector<128x256xf32>,
    return
  }
  func.func @transform_0(%arg0: i32) -> (i32, i32) {
    %c0_i32 = arith.constant 0 : i32
    %c0_i32_0 = arith.constant 0 : i32
    return %arg0, %c0_i32 : i32, i32
  }
  func.func @transform_1(%arg0: i32) -> (i32, i32) {
    %c0_i32 = arith.constant 0 : i32
    %c0_i32_0 = arith.constant 0 : i32
    %c0_i32_1 = arith.constant 0 : i32
    return %c0_i32, %c0_i32_0 : i32, i32
  }
  func.func @transform_2(%arg0: i32) -> (i32, i32) {
    %c0_i32 = arith.constant 0 : i32
    %c0_i32_0 = arith.constant 0 : i32
    %c0_i32_1 = arith.constant 0 : i32
    return %c0_i32, %c0_i32_0 : i32, i32
  }
  func.func @transform_3(%arg0: i32) -> (i32, i32) {
    %c0_i32 = arith.constant 0 : i32
    %c0_i32_0 = arith.constant 0 : i32
    return %arg0, %c0_i32 : i32, i32
  }
}

</mosaic_0001>

<bundles_post_ra>
// kernel: custom_norm_forward.1
= control target key start
LH: loop header
LB: loop body
LE: loop exit
PB: predicated region body
PF: predicated region fallthrough
CT: control target
= control target key end

     0   :  { %8 = vsyncpa [#allocation3], 0  ;;  %s959_s0 = inlined_call_operand.hbm [shape: f32[128,256], index: 0, kind: input, shape index: {}]   ;;  %s960_s1 = inlined_call_operand.vmem [shape: f32[1,256], index: 1, kind: input, shape index: {}]   ;;  %s961_s2 = inlined_call_operand.vmem [shape: f32[1,256], index: 2, kind: input, shape index: {}]   ;;  %s962_s3 = inlined_call_operand.hbm [shape: f32[128,256], index: 3, kind: output, shape index: {}]  }
   0x1   :  { %9 = vsyncpa [#allocation4], 0  ;;  %s539_s12 = smov [#allocation2]   ;;  %s491_s16 = scalar_lea.hbm %s959_s0, 4096 }
   0x2   :  { %s15_s13 = sshll.u32 %s539_s12, 4  ;;  %p492_p0 = scmp.ne.s32.totalorder %s959_s0, %s491_s16  ;;  %s16_s13 = int_to_ptr.vmem [resolvable:$true] %s15_s13 }
   0x3   :  { %p495_p1 = scmp.lt.u32.totalorder %s491_s16, %s959_s0 }
   0x5   :  { %p497_p2 = pnand %p495_p1, %p492_p0 }
   0x7   :  { %500 = shalt.err (!%p497_p2)
}
   0x8   :  { %s501_s21 = scalar_lea.vmem %s16_s13, 4096  ;;  %p506_p4 = scmp.lt.s32.totalorder %s16_s13, %s16_s13 }
   0x9   :  { %p502_p3 = scmp.ne.s32.totalorder %s16_s13, %s501_s21  ;;  %p507_p5 = scmp.lt.s32.totalorder %s501_s21, %s501_s21 }
   0xb   :  { %p508_p6 = por %p507_p5, %p506_p4 }
   0xd   :  { %p509_p7 = pnand %p508_p6, %p502_p3 }
   0xf   :  { %512 = shalt.err (!%p509_p7)
}
  0x10   :  { %s540_s22 = smov 256   ;;  %s541_s23 = smov 16  }
  0x11   :  { %21 = dma.hbm_to_vmem [thread:$0]  %s959_s0, 4096, %s16_s13, [#allocation3], %s540_s22, %s540_s22, %s541_s23  }
  0x12   :  { %535 = dma.done.wait [#allocation3], 4096  }
  0x13   :  { %536 = vsyncadd [#allocation3], 4294963200  ;;  %v578_v0 = vld [vmem:[#allocation2] sm:$0xff]  ;;  %v580_v1 = vld [vmem:[#allocation2 + $0x8] sm:$0xff] }
  0x14   :  { %v582_v2 = vld [vmem:[#allocation2 + $0x20] sm:$0xff]  ;;  %v61_v3 = vadd.f32 %v580_v1, %v578_v0  ;;  %v586_v4 = vld [vmem:[#allocation2 + $0x28] sm:$0xff]  ;;  %v588_v5 = vld [vmem:[#allocation2 + $0x10] sm:$0xff] }
  0x15   :  { %v590_v6 = vld [vmem:[#allocation2 + $0x18] sm:$0xff]  ;;  %v67_v7 = vadd.f32 %v586_v4, %v582_v2  ;;  %v594_v8 = vld [vmem:[#allocation2 + $0x30] sm:$0xff]  ;;  %v602_v12 = vld [vmem:[#allocation2 + $0x40] sm:$0xff] }
  0x16   :  { %v596_v9 = vld [vmem:[#allocation2 + $0x38] sm:$0xff]  ;;  %62 = vadd.xlane.f32.xlu0 %v61_v3  ;;  %v64_v10 = vadd.f32 %v590_v6, %v588_v5  ;;  %v604_v13 = vld [vmem:[#allocation2 + $0x48] sm:$0xff]  ;;  %v606_v14 = vld [vmem:[#allocation2 + $0x50] sm:$0xff] }
  0x17   :  { %68 = vadd.xlane.f32.xlu1 %v67_v7  ;;  %v70_v11 = vadd.f32 %v596_v9, %v594_v8  ;;  %v608_v15 = vld [vmem:[#allocation2 + $0x58] sm:$0xff]  ;;  %v73_v16 = vadd.f32 %v604_v13, %v602_v12  ;;  %v614_v18 = vld [vmem:[#allocation2 + $0x60] sm:$0xff]  ;;  %v616_v19 = vld [vmem:[#allocation2 + $0x68] sm:$0xff] }
  0x18   :  { %v76_v17 = vadd.f32 %v608_v15, %v606_v14  ;;  %v618_v20 = vld [vmem:[#allocation2 + $0x70] sm:$0xff]  ;;  %v620_v21 = vld [vmem:[#allocation2 + $0x78] sm:$0xff]  ;;  %v79_v22 = vadd.f32 %v616_v19, %v614_v18  ;;  %v626_v24 = vld [vmem:[#allocation2 + $0x80] sm:$0xff] }
  0x19   :  { %v82_v23 = vadd.f32 %v620_v21, %v618_v20  ;;  %v628_v25 = vld [vmem:[#allocation2 + $0x88] sm:$0xff]  ;;  %v630_v26 = vld [vmem:[#allocation2 + $0x90] sm:$0xff]  ;;  %v632_v27 = vld [vmem:[#allocation2 + $0x98] sm:$0xff] }
  0x1a   :  { %65 = vadd.xlane.f32.xlu0 %v64_v10  ;;  %v85_v28 = vadd.f32 %v628_v25, %v626_v24  ;;  %v88_v29 = vadd.f32 %v632_v27, %v630_v26  ;;  %v638_v30 = vld [vmem:[#allocation2 + $0xa0] sm:$0xff]  ;;  %v640_v31 = vld [vmem:[#allocation2 + $0xa8] sm:$0xff]  ;;  %v642_v32 = vld [vmem:[#allocation2 + $0xb0] sm:$0xff] }
  0x1b   :  { %71 = vadd.xlane.f32.xlu1 %v70_v11  ;;  %v644_v33 = vld [vmem:[#allocation2 + $0xb8] sm:$0xff]  ;;  %v91_v34 = vadd.f32 %v640_v31, %v638_v30  ;;  %v650_v36 = vld [vmem:[#allocation2 + $0xc0] sm:$0xff]  ;;  %v652_v37 = vld [vmem:[#allocation2 + $0xc8] sm:$0xff] }
  0x1c   :  { %v94_v35 = vadd.f32 %v644_v33, %v642_v32  ;;  %v654_v38 = vld [vmem:[#allocation2 + $0xd0] sm:$0xff]  ;;  %v656_v39 = vld [vmem:[#allocation2 + $0xd8] sm:$0xff]  ;;  %v97_v40 = vadd.f32 %v652_v37, %v650_v36  ;;  %v662_v42 = vld [vmem:[#allocation2 + $0xe0] sm:$0xff] }
  0x1d   :  { %v100_v41 = vadd.f32 %v656_v39, %v654_v38  ;;  %v664_v43 = vld [vmem:[#allocation2 + $0xe8] sm:$0xff]  ;;  %v666_v44 = vld [vmem:[#allocation2 + $0xf0] sm:$0xff]  ;;  %v668_v45 = vld [vmem:[#allocation2 + $0xf8] sm:$0xff] }
  0x1e   :  { %74 = vadd.xlane.f32.xlu0 %v73_v16  ;;  %v103_v46 = vadd.f32 %v664_v43, %v662_v42  ;;  %v106_v47 = vadd.f32 %v668_v45, %v666_v44 }
  0x1f   :  { %77 = vadd.xlane.f32.xlu1 %v76_v17 }
  0x22   :  { %80 = vadd.xlane.f32.xlu0 %v79_v22 }
  0x23   :  { %83 = vadd.xlane.f32.xlu1 %v82_v23 }
  0x26   :  { %86 = vadd.xlane.f32.xlu0 %v85_v28 }
  0x27   :  { %89 = vadd.xlane.f32.xlu1 %v88_v29 }
  0x2a   :  { %92 = vadd.xlane.f32.xlu0 %v91_v34 }
  0x2b   :  { %95 = vadd.xlane.f32.xlu1 %v94_v35 }
  0x2e   :  { %98 = vadd.xlane.f32.xlu0 %v97_v40 }
  0x2f   :  { %101 = vadd.xlane.f32.xlu1 %v100_v41 }
  0x32   :  { %104 = vadd.xlane.f32.xlu0 %v103_v46 }
  0x33   :  { %107 = vadd.xlane.f32.xlu1 %v106_v47 }
  0xa3   :  { %v63_v48 = vpop.xlane.xlu0 %62 }
  0xa4   :  { %v110_v49 = vmul.f32 0.00390625, %v63_v48  ;;  %v69_v50 = vpop.xlane.xlu1 %68 }
  0xa5   :  { %v112_v51 = vmul.f32 0.00390625, %v69_v50 }
  0xa6   :  { %v675_v52 = vsub.f32 %v578_v0, %v110_v49  ;;  %v678_v53 = vsub.f32 %v580_v1, %v110_v49 }
  0xa7   :  { %v681_v54 = vsub.f32 %v582_v2, %v112_v51  ;;  %v684_v55 = vsub.f32 %v586_v4, %v112_v51  ;;  %v66_v56 = vpop.xlane.xlu0 %65 }
  0xa8   :  { %v111_v57 = vmul.f32 0.00390625, %v66_v56  ;;  %v72_v58 = vpop.xlane.xlu1 %71  ;;  %v158_v59 = vmul.f32 %v675_v52, %v675_v52  ;;  %v159_v60 = vmul.f32 %v678_v53, %v678_v53 }
  0xa9   :  { %v113_v61 = vmul.f32 0.00390625, %v72_v58  ;;  %v162_v62 = vmul.f32 %v681_v54, %v681_v54  ;;  %v163_v63 = vmul.f32 %v684_v55, %v684_v55 }
  0xaa   :  { %v695_v0 = vsub.f32 %v588_v5, %v111_v57  ;;  %v698_v1 = vsub.f32 %v590_v6, %v111_v57  ;;  %v190_v2 = vadd.f32 %v159_v60, %v158_v59 }
  0xab   :  { %v701_v3 = vsub.f32 %v594_v8, %v113_v61  ;;  %v704_v4 = vsub.f32 %v596_v9, %v113_v61  ;;  %v75_v7 = vpop.xlane.xlu0 %74  ;;  %v196_v16 = vadd.f32 %v163_v63, %v162_v62 }
  0xac   :  { %v114_v10 = vmul.f32 0.00390625, %v75_v7  ;;  %191 = vadd.xlane.f32.xlu0 %v190_v2  ;;  %v78_v11 = vpop.xlane.xlu1 %77  ;;  %v160_v17 = vmul.f32 %v695_v0, %v695_v0  ;;  %v161_v5 = vmul.f32 %v698_v1, %v698_v1 }
  0xad   :  { %v115_v6 = vmul.f32 0.00390625, %v78_v11  ;;  %v164_v22 = vmul.f32 %v701_v3, %v701_v3  ;;  %v165_v8 = vmul.f32 %v704_v4, %v704_v4 }
  0xae   :  { %v715_v9 = vsub.f32 %v602_v12, %v114_v10  ;;  %v718_v23 = vsub.f32 %v604_v13, %v114_v10  ;;  %v193_v28 = vadd.f32 %v161_v5, %v160_v17 }
  0xaf   :  { %v721_v29 = vsub.f32 %v606_v14, %v115_v6  ;;  %v724_v34 = vsub.f32 %v608_v15, %v115_v6  ;;  %v81_v35 = vpop.xlane.xlu0 %80  ;;  %v199_v46 = vadd.f32 %v165_v8, %v164_v22 }
  0xb0   :  { %v116_v40 = vmul.f32 0.00390625, %v81_v35  ;;  %197 = vadd.xlane.f32.xlu0 %v196_v16  ;;  %194 = vadd.xlane.f32.xlu1 %v193_v28  ;;  %v84_v41 = vpop.xlane.xlu1 %83  ;;  %v166_v12 = vmul.f32 %v715_v9, %v715_v9  ;;  %v167_v13 = vmul.f32 %v718_v23, %v718_v23 }
  0xb1   :  { %v117_v47 = vmul.f32 0.00390625, %v84_v41  ;;  %v168_v14 = vmul.f32 %v721_v29, %v721_v29  ;;  %v169_v15 = vmul.f32 %v724_v34, %v724_v34 }
  0xb2   :  { %v735_v48 = vsub.f32 %v614_v18, %v116_v40  ;;  %v738_v49 = vsub.f32 %v616_v19, %v116_v40  ;;  %v202_v50 = vadd.f32 %v167_v13, %v166_v12 }
  0xb3   :  { %v741_v51 = vsub.f32 %v618_v20, %v117_v47  ;;  %v744_v56 = vsub.f32 %v620_v21, %v117_v47  ;;  %v87_v57 = vpop.xlane.xlu0 %86  ;;  %v205_v60 = vadd.f32 %v169_v15, %v168_v14 }
  0xb4   :  { %v118_v58 = vmul.f32 0.00390625, %v87_v57  ;;  %200 = vadd.xlane.f32.xlu1 %v199_v46  ;;  %203 = vadd.xlane.f32.xlu0 %v202_v50  ;;  %v90_v59 = vpop.xlane.xlu1 %89  ;;  %v170_v18 = vmul.f32 %v735_v48, %v735_v48  ;;  %v171_v19 = vmul.f32 %v738_v49, %v738_v49 }
  0xb5   :  { %v119_v61 = vmul.f32 0.00390625, %v90_v59  ;;  %v172_v20 = vmul.f32 %v741_v51, %v741_v51  ;;  %v173_v21 = vmul.f32 %v744_v56, %v744_v56 }
  0xb6   :  { %v755_v62 = vsub.f32 %v626_v24, %v118_v58  ;;  %v758_v63 = vsub.f32 %v628_v25, %v118_v58  ;;  %v208_v2 = vadd.f32 %v171_v19, %v170_v18 }
  0xb7   :  { %v761_v7 = vsub.f32 %v630_v26, %v119_v61  ;;  %v764_v10 = vsub.f32 %v632_v27, %v119_v61  ;;  %v93_v11 = vpop.xlane.xlu0 %92  ;;  %v211_v5 = vadd.f32 %v173_v21, %v172_v20 }
  0xb8   :  { %v120_v16 = vmul.f32 0.00390625, %v93_v11  ;;  %206 = vadd.xlane.f32.xlu1 %v205_v60  ;;  %209 = vadd.xlane.f32.xlu0 %v208_v2  ;;  %v96_v17 = vpop.xlane.xlu1 %95  ;;  %v174_v24 = vmul.f32 %v755_v62, %v755_v62  ;;  %v175_v25 = vmul.f32 %v758_v63, %v758_v63 }
  0xb9   :  { %v121_v6 = vmul.f32 0.00390625, %v96_v17  ;;  %v176_v26 = vmul.f32 %v761_v7, %v761_v7  ;;  %v177_v27 = vmul.f32 %v764_v10, %v764_v10 }
  0xba   :  { %v775_v22 = vsub.f32 %v638_v30, %v120_v16  ;;  %v778_v8 = vsub.f32 %v640_v31, %v120_v16  ;;  %v214_v28 = vadd.f32 %v175_v25, %v174_v24 }
  0xbb   :  { %v781_v35 = vsub.f32 %v642_v32, %v121_v6  ;;  %v784_v40 = vsub.f32 %v644_v33, %v121_v6  ;;  %v99_v41 = vpop.xlane.xlu0 %98  ;;  %v217_v13 = vadd.f32 %v177_v27, %v176_v26  ;;  %v320_v26 = vlaneseq }
  0xbc   :  { %v122_v46 = vmul.f32 0.00390625, %v99_v41  ;;  %212 = vadd.xlane.f32.xlu1 %v211_v5  ;;  %215 = vadd.xlane.f32.xlu0 %v214_v28  ;;  %v102_v12 = vpop.xlane.xlu1 %101  ;;  %v178_v30 = vmul.f32 %v775_v22, %v775_v22  ;;  %v179_v31 = vmul.f32 %v778_v8, %v778_v8 }
  0xbd   :  { %v123_v47 = vmul.f32 0.00390625, %v102_v12  ;;  %v180_v32 = vmul.f32 %v781_v35, %v781_v35  ;;  %v181_v33 = vmul.f32 %v784_v40, %v784_v40 }
  0xbe   :  { %v795_v14 = vsub.f32 %v650_v36, %v122_v46  ;;  %v798_v15 = vsub.f32 %v652_v37, %v122_v46  ;;  %v220_v50 = vadd.f32 %v179_v31, %v178_v30 }
  0xbf   :  { %v801_v57 = vsub.f32 %v654_v38, %v123_v47  ;;  %v804_v58 = vsub.f32 %v656_v39, %v123_v47  ;;  %v105_v59 = vpop.xlane.xlu0 %104  ;;  %v223_v19 = vadd.f32 %v181_v33, %v180_v32 }
  0xc0   :  { %v124_v60 = vmul.f32 0.00390625, %v105_v59  ;;  %218 = vadd.xlane.f32.xlu1 %v217_v13  ;;  %221 = vadd.xlane.f32.xlu0 %v220_v50  ;;  %v108_v18 = vpop.xlane.xlu1 %107  ;;  %v182_v36 = vmul.f32 %v795_v14, %v795_v14  ;;  %v183_v37 = vmul.f32 %v798_v15, %v798_v15  ;;  %v321_v13 = vshrl.u32 %v320_v26, 7 }
  0xc1   :  { %v125_v61 = vmul.f32 0.00390625, %v108_v18  ;;  %v184_v38 = vmul.f32 %v801_v57, %v801_v57  ;;  %v185_v39 = vmul.f32 %v804_v58, %v804_v58  ;;  %v318_v18 = vld [vmem:[%s960_s1] sm:$0x3]  ;;  %s542_s1 = smov [#allocation5]  }
  0xc2   :  { %v815_v20 = vsub.f32 %v662_v42, %v124_v60  ;;  %v818_v21 = vsub.f32 %v664_v43, %v124_v60  ;;  %v226_v2 = vadd.f32 %v183_v37, %v182_v36  ;;  %v322_v59 = vsub.s32 0, %v321_v13 }
  0xc3   :  { %v821_v11 = vsub.f32 %v666_v44, %v125_v61  ;;  %v824_v16 = vsub.f32 %v668_v45, %v125_v61  ;;  %v229_v17 = vadd.f32 %v185_v39, %v184_v38  ;;  %v326_v60 = vsub.s32 1, %v321_v13  ;;  %v362_v38 = vld [vmem:[%s961_s2] sm:$0x3]  ;;  %s443_s2 = sshll.u32 %s542_s1, 4  ;;  %s444_s2 = int_to_ptr.vmem [resolvable:$true] %s443_s2 }
  0xc4   :  { %224 = vadd.xlane.f32.xlu1 %v223_v19  ;;  %227 = vadd.xlane.f32.xlu0 %v226_v2  ;;  %v186_v5 = vmul.f32 %v815_v20, %v815_v20  ;;  %v187_v42 = vmul.f32 %v818_v21, %v818_v21  ;;  %s513_s29 = scalar_lea.vmem %s444_s2, 4096  ;;  %p518_p9 = scmp.lt.s32.totalorder %s444_s2, %s444_s2 }
  0xc5   :  { %v188_v43 = vmul.f32 %v821_v11, %v821_v11  ;;  %v189_v24 = vmul.f32 %v824_v16, %v824_v16  ;;  %p514_p8 = scmp.ne.s32.totalorder %s444_s2, %s513_s29  ;;  %p519_p10 = scmp.lt.s32.totalorder %s513_s29, %s513_s29 }
  0xc6   :  { %v232_v44 = vadd.f32 %v187_v42, %v186_v5  ;;  %v842_v5 = vrot.slane %v318_v18, %v326_v60 }
  0xc7   :  { %v235_v45 = vadd.f32 %v189_v24, %v188_v43  ;;  %p520_p11 = por %p519_p10, %p518_p9 }
  0xc8   :  { %230 = vadd.xlane.f32.xlu1 %v229_v17  ;;  %233 = vadd.xlane.f32.xlu0 %v232_v44  ;;  %v840_v17 = vrot.slane %v318_v18, %v322_v59  ;;  %v844_v44 = vrot.slane %v362_v38, %v322_v59 }
  0xc9   :  { %p521_p12 = pnand %p520_p11, %p514_p8 }
  0xcc   :  { %236 = vadd.xlane.f32.xlu1 %v235_v45  ;;  %v846_v45 = vrot.slane %v362_v38, %v326_v60 }
 0x139   :  { %v192_v25 = vpop.xlane.xlu0 %191 }
 0x13a   :  { %v238_v6 = vmul.f32 0.00390625, %v192_v25 }
 0x13c   :  { %v254_v27 = vadd.f32 1e-05, %v238_v6 }
 0x13d   :  { %v195_v28 = vpop.xlane.xlu1 %194  ;;  %v198_v41 = vpop.xlane.xlu0 %197 }
 0x13e   :  { %459 = vrsqrt.f32 %v254_v27  ;;  %v239_v46 = vmul.f32 0.00390625, %v195_v28  ;;  %v240_v12 = vmul.f32 0.00390625, %v198_v41 }
 0x140   :  { %v255_v30 = vadd.f32 1e-05, %v239_v46  ;;  %v256_v31 = vadd.f32 1e-05, %v240_v12 }
 0x141   :  { %v201_v47 = vpop.xlane.xlu1 %200  ;;  %v204_v32 = vpop.xlane.xlu0 %203 }
 0x142   :  { %461 = vrsqrt.f32 %v255_v30  ;;  %v241_v33 = vmul.f32 0.00390625, %v201_v47  ;;  %v242_v50 = vmul.f32 0.00390625, %v204_v32 }
 0x143   :  { %463 = vrsqrt.f32 %v256_v31 }
 0x144   :  { %v257_v19 = vadd.f32 1e-05, %v241_v33  ;;  %v258_v36 = vadd.f32 1e-05, %v242_v50 }
 0x145   :  { %v207_v37 = vpop.xlane.xlu1 %206  ;;  %v210_v61 = vpop.xlane.xlu0 %209 }
 0x146   :  { %465 = vrsqrt.f32 %v257_v19  ;;  %v243_v39 = vmul.f32 0.00390625, %v207_v37  ;;  %v244_v2 = vmul.f32 0.00390625, %v210_v61 }
 0x147   :  { %467 = vrsqrt.f32 %v258_v36 }
 0x148   :  { %v460_v42 = vpop.eup %459  ;;  %v259_v43 = vadd.f32 1e-05, %v243_v39  ;;  %v260_v24 = vadd.f32 1e-05, %v244_v2 }
 0x149   :  { %v286_v25 = vmul.f32 %v460_v42, %v675_v52  ;;  %v287_v6 = vmul.f32 %v460_v42, %v678_v53  ;;  %v213_v26 = vpop.xlane.xlu1 %212  ;;  %v216_v27 = vpop.xlane.xlu0 %215 }
 0x14a   :  { %469 = vrsqrt.f32 %v259_v43  ;;  %v245_v28 = vmul.f32 0.00390625, %v213_v26  ;;  %v246_v41 = vmul.f32 0.00390625, %v216_v27 }
 0x14b   :  { %v330_v46 = vmul.f32 %v840_v17, %v286_v25  ;;  %v331_v12 = vmul.f32 %v842_v5, %v287_v6  ;;  %471 = vrsqrt.f32 %v260_v24 }
 0x14c   :  { %v462_v13 = vpop.eup %461  ;;  %v261_v30 = vadd.f32 1e-05, %v245_v28  ;;  %v262_v31 = vadd.f32 1e-05, %v246_v41 }
 0x14d   :  { %v464_v47 = vpop.eup %463  ;;  %v374_v32 = vadd.f32 %v844_v44, %v330_v46  ;;  %v375_v52 = vadd.f32 %v846_v45, %v331_v12  ;;  %v288_v53 = vmul.f32 %v462_v13, %v695_v0  ;;  %v289_v33 = vmul.f32 %v462_v13, %v698_v1  ;;  %v219_v50 = vpop.xlane.xlu1 %218 }
 0x14e   :  { %v222_v59 = vpop.xlane.xlu0 %221  ;;  %v290_v60 = vmul.f32 %v464_v47, %v681_v54  ;;  %v291_v18 = vmul.f32 %v464_v47, %v684_v55  ;;  %473 = vrsqrt.f32 %v261_v30  ;;  %v247_v19 = vmul.f32 0.00390625, %v219_v50 }
 0x14f   :  { %406 = vst [vmem:[#allocation5] sm:$0xff] %v374_v32  ;;  %407 = vst [vmem:[#allocation5 + $0x8] sm:$0xff] %v375_v52  ;;  %v332_v36 = vmul.f32 %v840_v17, %v288_v53  ;;  %v333_v37 = vmul.f32 %v842_v5, %v289_v33  ;;  %475 = vrsqrt.f32 %v262_v31  ;;  %v248_v61 = vmul.f32 0.00390625, %v222_v59 }
 0x150   :  { %v466_v38 = vpop.eup %465  ;;  %v334_v0 = vmul.f32 %v840_v17, %v290_v60  ;;  %v335_v1 = vmul.f32 %v842_v5, %v291_v18  ;;  %v263_v39 = vadd.f32 1e-05, %v247_v19 }
 0x151   :  { %v468_v2 = vpop.eup %467  ;;  %v376_v54 = vadd.f32 %v844_v44, %v332_v36  ;;  %v377_v55 = vadd.f32 %v846_v45, %v333_v37  ;;  %v292_v42 = vmul.f32 %v466_v38, %v701_v3  ;;  %v293_v43 = vmul.f32 %v466_v38, %v704_v4  ;;  %v225_v24 = vpop.xlane.xlu1 %224 }
 0x152   :  { %v228_v25 = vpop.xlane.xlu0 %227  ;;  %v378_v6 = vadd.f32 %v844_v44, %v334_v0  ;;  %v379_v26 = vadd.f32 %v846_v45, %v335_v1  ;;  %v294_v27 = vmul.f32 %v468_v2, %v715_v9  ;;  %v295_v28 = vmul.f32 %v468_v2, %v718_v23 }
 0x153   :  { %408 = vst [vmem:[#allocation5 + $0x10] sm:$0xff] %v376_v54  ;;  %409 = vst [vmem:[#allocation5 + $0x18] sm:$0xff] %v377_v55  ;;  %v336_v41 = vmul.f32 %v840_v17, %v292_v42  ;;  %v337_v46 = vmul.f32 %v842_v5, %v293_v43  ;;  %477 = vrsqrt.f32 %v263_v39  ;;  %v264_v3 = vadd.f32 1e-05, %v248_v61 }
 0x154   :  { %v470_v12 = vpop.eup %469  ;;  %410 = vst [vmem:[#allocation5 + $0x20] sm:$0xff] %v378_v6  ;;  %411 = vst [vmem:[#allocation5 + $0x28] sm:$0xff] %v379_v26  ;;  %v338_v4 = vmul.f32 %v840_v17, %v294_v27  ;;  %v339_v13 = vmul.f32 %v842_v5, %v295_v28  ;;  %v249_v30 = vmul.f32 0.00390625, %v225_v24  ;;  %v250_v31 = vmul.f32 0.00390625, %v228_v25 }
 0x155   :  { %v472_v9 = vpop.eup %471  ;;  %v380_v23 = vadd.f32 %v844_v44, %v336_v41  ;;  %v381_v47 = vadd.f32 %v846_v45, %v337_v46  ;;  %v296_v32 = vmul.f32 %v470_v12, %v721_v29  ;;  %v297_v52 = vmul.f32 %v470_v12, %v724_v34  ;;  %v231_v53 = vpop.xlane.xlu1 %230 }
 0x156   :  { %v382_v33 = vadd.f32 %v844_v44, %v338_v4  ;;  %v383_v50 = vadd.f32 %v846_v45, %v339_v13  ;;  %v298_v59 = vmul.f32 %v472_v9, %v735_v48  ;;  %v299_v60 = vmul.f32 %v472_v9, %v738_v49  ;;  %v234_v2 = vpop.xlane.xlu0 %233 }
 0x157   :  { %412 = vst [vmem:[#allocation5 + $0x30] sm:$0xff] %v380_v23  ;;  %413 = vst [vmem:[#allocation5 + $0x38] sm:$0xff] %v381_v47  ;;  %v340_v18 = vmul.f32 %v840_v17, %v296_v32  ;;  %v341_v19 = vmul.f32 %v842_v5, %v297_v52  ;;  %479 = vrsqrt.f32 %v264_v3  ;;  %v265_v36 = vadd.f32 1e-05, %v249_v30 }
 0x158   :  { %v474_v29 = vpop.eup %473  ;;  %414 = vst [vmem:[#allocation5 + $0x40] sm:$0xff] %v382_v33  ;;  %415 = vst [vmem:[#allocation5 + $0x48] sm:$0xff] %v383_v50  ;;  %v342_v34 = vmul.f32 %v840_v17, %v298_v59  ;;  %v343_v37 = vmul.f32 %v842_v5, %v299_v60  ;;  %v266_v61 = vadd.f32 1e-05, %v250_v31  ;;  %v251_v38 = vmul.f32 0.00390625, %v231_v53 }
 0x159   :  { %v476_v48 = vpop.eup %475  ;;  %v384_v49 = vadd.f32 %v844_v44, %v340_v18  ;;  %v385_v0 = vadd.f32 %v846_v45, %v341_v19  ;;  %v300_v1 = vmul.f32 %v474_v29, %v741_v51  ;;  %v301_v39 = vmul.f32 %v474_v29, %v744_v56  ;;  %v237_v24 = vpop.xlane.xlu1 %236 }
 0x15a   :  { %v386_v54 = vadd.f32 %v844_v44, %v342_v34  ;;  %v387_v55 = vadd.f32 %v846_v45, %v343_v37  ;;  %v302_v42 = vmul.f32 %v476_v48, %v755_v62  ;;  %v303_v43 = vmul.f32 %v476_v48, %v758_v63 }
 0x15b   :  { %416 = vst [vmem:[#allocation5 + $0x50] sm:$0xff] %v384_v49  ;;  %417 = vst [vmem:[#allocation5 + $0x58] sm:$0xff] %v385_v0  ;;  %v344_v25 = vmul.f32 %v840_v17, %v300_v1  ;;  %v345_v6 = vmul.f32 %v842_v5, %v301_v39  ;;  %481 = vrsqrt.f32 %v265_v36  ;;  %v267_v51 = vadd.f32 1e-05, %v251_v38 }
 0x15c   :  { %418 = vst [vmem:[#allocation5 + $0x60] sm:$0xff] %v386_v54  ;;  %419 = vst [vmem:[#allocation5 + $0x68] sm:$0xff] %v387_v55  ;;  %v346_v56 = vmul.f32 %v840_v17, %v302_v42  ;;  %v347_v26 = vmul.f32 %v842_v5, %v303_v43  ;;  %483 = vrsqrt.f32 %v266_v61  ;;  %v252_v27 = vmul.f32 0.00390625, %v234_v2 }
 0x15d   :  { %v478_v62 = vpop.eup %477  ;;  %v388_v63 = vadd.f32 %v844_v44, %v344_v25  ;;  %v389_v28 = vadd.f32 %v846_v45, %v345_v6  ;;  %485 = vrsqrt.f32 %v267_v51  ;;  %v253_v41 = vmul.f32 0.00390625, %v237_v24 }
 0x15e   :  { %v390_v46 = vadd.f32 %v844_v44, %v346_v56  ;;  %v391_v3 = vadd.f32 %v846_v45, %v347_v26  ;;  %v304_v12 = vmul.f32 %v478_v62, %v761_v7  ;;  %v305_v4 = vmul.f32 %v478_v62, %v764_v10 }
 0x15f   :  { %420 = vst [vmem:[#allocation5 + $0x70] sm:$0xff] %v388_v63  ;;  %421 = vst [vmem:[#allocation5 + $0x78] sm:$0xff] %v389_v28  ;;  %v268_v13 = vadd.f32 1e-05, %v252_v27  ;;  %v269_v30 = vadd.f32 1e-05, %v253_v41 }
 0x160   :  { %422 = vst [vmem:[#allocation5 + $0x80] sm:$0xff] %v390_v46  ;;  %423 = vst [vmem:[#allocation5 + $0x88] sm:$0xff] %v391_v3  ;;  %v348_v31 = vmul.f32 %v840_v17, %v304_v12  ;;  %v349_v9 = vmul.f32 %v842_v5, %v305_v4 }
 0x161   :  { %v480_v23 = vpop.eup %479  ;;  %487 = vrsqrt.f32 %v268_v13 }
 0x162   :  { %v392_v47 = vadd.f32 %v844_v44, %v348_v31  ;;  %v393_v32 = vadd.f32 %v846_v45, %v349_v9  ;;  %v306_v7 = vmul.f32 %v480_v23, %v775_v22  ;;  %v307_v10 = vmul.f32 %v480_v23, %v778_v8 }
 0x163   :  { %489 = vrsqrt.f32 %v269_v30 }
 0x164   :  { %424 = vst [vmem:[#allocation5 + $0x90] sm:$0xff] %v392_v47  ;;  %425 = vst [vmem:[#allocation5 + $0x98] sm:$0xff] %v393_v32  ;;  %v350_v52 = vmul.f32 %v840_v17, %v306_v7  ;;  %v351_v53 = vmul.f32 %v842_v5, %v307_v10 }
 0x165   :  { %v482_v33 = vpop.eup %481 }
 0x166   :  { %v484_v50 = vpop.eup %483  ;;  %v394_v59 = vadd.f32 %v844_v44, %v350_v52  ;;  %v395_v60 = vadd.f32 %v846_v45, %v351_v53  ;;  %v308_v18 = vmul.f32 %v482_v33, %v781_v35  ;;  %v309_v19 = vmul.f32 %v482_v33, %v784_v40 }
 0x167   :  { %v486_v22 = vpop.eup %485  ;;  %v310_v8 = vmul.f32 %v484_v50, %v795_v14  ;;  %v311_v36 = vmul.f32 %v484_v50, %v798_v15 }
 0x168   :  { %426 = vst [vmem:[#allocation5 + $0xa0] sm:$0xff] %v394_v59  ;;  %427 = vst [vmem:[#allocation5 + $0xa8] sm:$0xff] %v395_v60  ;;  %v352_v29 = vmul.f32 %v840_v17, %v308_v18  ;;  %v353_v34 = vmul.f32 %v842_v5, %v309_v19  ;;  %v312_v37 = vmul.f32 %v486_v22, %v801_v57 }
 0x169   :  { %v313_v61 = vmul.f32 %v486_v22, %v804_v58  ;;  %v354_v38 = vmul.f32 %v840_v17, %v310_v8  ;;  %v355_v35 = vmul.f32 %v842_v5, %v311_v36 }
 0x16a   :  { %v396_v40 = vadd.f32 %v844_v44, %v352_v29  ;;  %v397_v14 = vadd.f32 %v846_v45, %v353_v34  ;;  %v356_v15 = vmul.f32 %v840_v17, %v312_v37 }
 0x16b   :  { %v357_v48 = vmul.f32 %v842_v5, %v313_v61  ;;  %v488_v49 = vpop.eup %487  ;;  %v398_v0 = vadd.f32 %v844_v44, %v354_v38  ;;  %v399_v1 = vadd.f32 %v846_v45, %v355_v35 }
 0x16c   :  { %428 = vst [vmem:[#allocation5 + $0xb0] sm:$0xff] %v396_v40  ;;  %429 = vst [vmem:[#allocation5 + $0xb8] sm:$0xff] %v397_v14  ;;  %v400_v57 = vadd.f32 %v844_v44, %v356_v15  ;;  %v314_v39 = vmul.f32 %v488_v49, %v815_v20  ;;  %v315_v2 = vmul.f32 %v488_v49, %v818_v21 }
 0x16d   :  { %v401_v58 = vadd.f32 %v846_v45, %v357_v48  ;;  %v490_v54 = vpop.eup %489  ;;  %430 = vst [vmem:[#allocation5 + $0xc0] sm:$0xff] %v398_v0  ;;  %431 = vst [vmem:[#allocation5 + $0xc8] sm:$0xff] %v399_v1 }
 0x16e   :  { %432 = vst [vmem:[#allocation5 + $0xd0] sm:$0xff] %v400_v57  ;;  %v358_v55 = vmul.f32 %v840_v17, %v314_v39  ;;  %v359_v42 = vmul.f32 %v842_v5, %v315_v2  ;;  %v316_v43 = vmul.f32 %v490_v54, %v821_v11  ;;  %v317_v24 = vmul.f32 %v490_v54, %v824_v16 }
 0x16f   :  { %433 = vst [vmem:[#allocation5 + $0xd8] sm:$0xff] %v401_v58 }
 0x170   :  { %v402_v25 = vadd.f32 %v844_v44, %v358_v55  ;;  %v403_v20 = vadd.f32 %v846_v45, %v359_v42  ;;  %v360_v21 = vmul.f32 %v840_v17, %v316_v43  ;;  %v361_v6 = vmul.f32 %v842_v5, %v317_v24 }
 0x172   :  { %434 = vst [vmem:[#allocation5 + $0xe0] sm:$0xff] %v402_v25  ;;  %435 = vst [vmem:[#allocation5 + $0xe8] sm:$0xff] %v403_v20  ;;  %v404_v51 = vadd.f32 %v844_v44, %v360_v21  ;;  %v405_v56 = vadd.f32 %v846_v45, %v361_v6 }
 0x174   :  { %436 = vst [vmem:[#allocation5 + $0xf0] sm:$0xff] %v404_v51  ;;  %437 = vst [vmem:[#allocation5 + $0xf8] sm:$0xff] %v405_v56 }
 0x175   :  { %524 = shalt.err (!%p521_p12)
}
 0x176   :  { %s525_s5 = scalar_lea.hbm %s962_s3, 4096 }
 0x177   :  { %p526_p13 = scmp.ne.s32.totalorder %s962_s3, %s525_s5  ;;  %p529_p0 = scmp.lt.u32.totalorder %s525_s5, %s962_s3 }
 0x179   :  { %p531_p1 = pnand %p529_p0, %p526_p13 }
 0x17b   :  { %534 = shalt.err (!%p531_p1)
}
 0x17c   :  { %449 = dma.vmem_to_hbm [thread:$0]  %s444_s2, 4096, %s962_s3, [#allocation4], %s540_s22, %s540_s22, %s541_s23  }
 0x17d   :  { %537 = dma.done.wait [#allocation4], 4096  }
 0x17e   :  { %538 = vsyncadd [#allocation4], 4294963200 }
 0x17f   :  { %453 = vsyncpa [#allocation3], 1 }
 0x180   :  { %454 = vsyncpa [#allocation4], 1 }

</bundles_post_ra>
